<compile_context>
chip_gen: v7x
topology: tpu7x:2x2x1
jax: 0.10.0
libtpu: 0.0.40
codegen_flags: <defaults>
</compile_context>

<pallas_src>
import math
import functools

import jax
import jax.numpy as jnp
from jax.experimental import pallas as pl
from jax.experimental.pallas import tpu as pltpu


# --------------------------------- kernel -----------------------------------

def mha_kernel(n_heads, q_ref, k_ref, v_ref,
               wq_ref, wk_ref, wv_ref, wo_ref, o_ref):
    """Fused multi-head attention over the whole (folded) batch.

    q_ref/k_ref/v_ref : (B, S, D) f32 activations.
    wq/wk/wv/wo       : (D, D) bf16 weights, input-major (y = x @ W);
                        1/sqrt(d_k) is pre-folded into wq by the wrapper.
    o_ref             : (B, S, D) f32 output.
    """
    B, S, D = q_ref.shape
    d_k = D // n_heads
    M = B * S

    # Flatten batch into the MXU M dimension; bf16 operands, f32 accumulation.
    q_in = q_ref[...].reshape(M, D).astype(jnp.bfloat16)
    k_in = k_ref[...].reshape(M, D).astype(jnp.bfloat16)
    v_in = v_ref[...].reshape(M, D).astype(jnp.bfloat16)

    # Input projections: three full-width (M, D) @ (D, D) bf16 matmuls.
    q = jnp.dot(q_in, wq_ref[...], preferred_element_type=jnp.float32)
    k = jnp.dot(k_in, wk_ref[...], preferred_element_type=jnp.float32)
    v = jnp.dot(v_in, wv_ref[...], preferred_element_type=jnp.float32)

    # Split heads onto a leading batch axis: (n_heads*B, S, d_k), n = h*B + b.
    # Only lane slices + leading-axis stacks (no lane-splitting reshapes or
    # 4-D transposes).
    def split_heads(x):
        x = x.reshape(B, S, D)
        parts = [x[:, :, h * d_k:(h + 1) * d_k] for h in range(n_heads)]
        return jnp.stack(parts, axis=0).reshape(n_heads * B, S, d_k)

    qh = split_heads(q).astype(jnp.bfloat16)
    kh = split_heads(k).astype(jnp.bfloat16)
    vh = split_heads(v).astype(jnp.bfloat16)

    # Scores: ONE batched MXU dot over all (head, batch) pairs; contraction on
    # the last dims of both operands (no explicit K transpose). Scale already
    # folded into Wq.
    scores = jnp.einsum('nqd,nkd->nqk', qh, kh,
                        preferred_element_type=jnp.float32)       # (HB, S, S)

    # Numerically-stable softmax with an exact divide.
    m = jnp.max(scores, axis=-1, keepdims=True)
    e = jnp.exp(scores - m)
    probs = e / jnp.sum(e, axis=-1, keepdims=True)
    # TODO(synk): mask support, train-mode dropout and the module's
    # self.attn_probs attribute caching are side effects outside this
    # eval-mode forward (mask=None, dropout == identity).

    # PV: second batched MXU dot, bf16 probabilities.
    heads = jnp.einsum('nqk,nkd->nqd', probs.astype(jnp.bfloat16), vh,
                       preferred_element_type=jnp.float32)        # (HB, S, d_k)

    # Merge heads back onto the lane axis -> ONE full-K output projection
    # (M, D) @ (D, D) instead of n_heads K=d_k matmuls plus VALU adds.
    heads = heads.reshape(n_heads, B, S, d_k)
    merged = jnp.concatenate(
        [heads[h].reshape(M, d_k) for h in range(n_heads)],
        axis=-1).astype(jnp.bfloat16)                             # (M, D)
    out = jnp.dot(merged, wo_ref[...],
                  preferred_element_type=jnp.float32)             # (M, D)

    # Lane-dense (last dim = 128) f32 store.
    o_ref[...] = out.reshape(B, S, D)


# -------------------------------- wrapper ------------------------------------

def multi_head_attention(q, k, v, wq, wk, wv, wo, n_heads):
    B, S, D = q.shape
    d_k = D // n_heads

    # Fold the attention scale into Wq (mathematically exact for the forward)
    # and cast all weights to bf16: native MXU dtype on v5e/v6e/v7x and half
    # the dominant weight DMA traffic.
    wq = (wq * (1.0 / math.sqrt(d_k))).astype(jnp.bfloat16)
    wk = wk.astype(jnp.bfloat16)
    wv = wv.astype(jnp.bfloat16)
    wo = wo.astype(jnp.bfloat16)

    def full(shape):
        return pl.BlockSpec(shape, lambda i, _s=shape: (0,) * len(_s))

    return pl.pallas_call(
        functools.partial(mha_kernel, n_heads),
        out_shape=jax.ShapeDtypeStruct((B, S, D), jnp.float32),
        grid=(1,),                       # batch folded: single step
        in_specs=[full((B, S, D)), full((B, S, D)), full((B, S, D)),
                  full((D, D)), full((D, D)), full((D, D)), full((D, D))],
        out_specs=full((B, S, D)),
        compiler_params=pltpu.CompilerParams(
            dimension_semantics=("arbitrary",)),
    )(q, k, v, wq, wk, wv, wo)


# ---------------------------- pure-JAX reference -----------------------------

def ref_mha(q, k, v, wq, wk, wv, wo, n_heads):
    B, S, D = q.shape
    d_k = D // n_heads

    def split(x):
        return x.reshape(B, S, n_heads, d_k).transpose(0, 2, 1, 3)

    qh, kh, vh = split(q @ wq), split(k @ wk), split(v @ wv)
    scores = jnp.einsum("bhqd,bhkd->bhqk", qh, kh) / math.sqrt(d_k)
    probs = jax.nn.softmax(scores, axis=-1)
    attn = jnp.einsum("bhqk,bhkd->bhqd", probs, vh)
    attn = attn.transpose(0, 2, 1, 3).reshape(B, S, D)
    return attn @ wo


# ----------------------------------- main -------------------------------------

if __name__ == "__main__":
    B, S = 2, 8
    n_heads, d_model = 4, 128          # d_k = 32; last dim lane-dense (128)

    key = jax.random.PRNGKey(0)
    kq, kk, kv, kwq, kwk, kwv, kwo = jax.random.split(key, 7)
    bound = 1.0 / math.sqrt(d_model)   # nn.Linear default init range

    q = jax.random.normal(kq, (B, S, d_model), jnp.float32)
    k = jax.random.normal(kk, (B, S, d_model), jnp.float32)
    v = jax.random.normal(kv, (B, S, d_model), jnp.float32)
    wq = jax.random.uniform(kwq, (d_model, d_model), jnp.float32, -bound, bound)
    wk = jax.random.uniform(kwk, (d_model, d_model), jnp.float32, -bound, bound)
    wv = jax.random.uniform(kwv, (d_model, d_model), jnp.float32, -bound, bound)
    wo = jax.random.uniform(kwo, (d_model, d_model), jnp.float32, -bound, bound)

    out = multi_head_attention(q, k, v, wq, wk, wv, wo, n_heads)
    out = jax.block_until_ready(out)

    ref = ref_mha(q, k, v, wq, wk, wv, wo, n_heads)
    assert out.shape == (B, S, d_model)
    # bf16 MXU operands (with f32 accumulation) dominate the numerical
    # difference vs. the pure-f32 reference.
    assert jnp.allclose(out, ref, atol=3e-2, rtol=3e-2), "mismatch vs reference"

    print("KERNEL_OK")
</pallas_src>

<mosaic_0001>
module attributes {stable_mosaic.version = 11 : i64} {
  func.func @mha_kernel(%arg0: i32, %arg1: memref<2x8x128xf32, #tpu.memory_space<vmem>>, %arg2: memref<2x8x128xf32, #tpu.memory_space<vmem>>, %arg3: memref<2x8x128xf32, #tpu.memory_space<vmem>>, %arg4: memref<128x128xbf16, #tpu.memory_space<vmem>>, %arg5: memref<128x128xbf16, #tpu.memory_space<vmem>>, %arg6: memref<128x128xbf16, #tpu.memory_space<vmem>>, %arg7: memref<128x128xbf16, #tpu.memory_space<vmem>>, %arg8: memref<2x8x128xf32, #tpu.memory_space<vmem>>) attributes {dimension_semantics = [#tpu.dimension_semantics<arbitrary>], iteration_bounds = array<i64: 1>, scalar_prefetch = 0 : i64, scratch_operands = 0 : i64, tpu.core_type = #tpu.core_type<tc>, window_params = [{pipeline_mode = #tpu.pipeline_mode<synchronous>, transform_indices = @transform_0, window_bounds = array<i64: 2, 8, 128>}, {pipeline_mode = #tpu.pipeline_mode<synchronous>, transform_indices = @transform_1, window_bounds = array<i64: 2, 8, 128>}, {pipeline_mode = #tpu.pipeline_mode<synchronous>, transform_indices = @transform_2, window_bounds = array<i64: 2, 8, 128>}, {pipeline_mode = #tpu.pipeline_mode<synchronous>, transform_indices = @transform_3, window_bounds = array<i64: 128, 128>}, {pipeline_mode = #tpu.pipeline_mode<synchronous>, transform_indices = @transform_4, window_bounds = array<i64: 128, 128>}, {pipeline_mode = #tpu.pipeline_mode<synchronous>, transform_indices = @transform_5, window_bounds = array<i64: 128, 128>}, {pipeline_mode = #tpu.pipeline_mode<synchronous>, transform_indices = @transform_6, window_bounds = array<i64: 128, 128>}, {pipeline_mode = #tpu.pipeline_mode<synchronous>, transform_indices = @transform_7, window_bounds = array<i64: 2, 8, 128>}]} {
    %c0 = arith.constant 0 : index
    %c0_0 = arith.constant 0 : index
    %c0_1 = arith.constant 0 : index
    %0 = vector.load %arg1[%c0, %c0_0, %c0_1] : memref<2x8x128xf32, #tpu.memory_space<vmem>>, vector<2x8x128xf32>
    %1 = vector.shape_cast %0 : vector<2x8x128xf32> to vector<16x128xf32>
    %2 = arith.truncf %1 : vector<16x128xf32> to vector<16x128xbf16>
    %c0_2 = arith.constant 0 : index
    %c0_3 = arith.constant 0 : index
    %c0_4 = arith.constant 0 : index
    %3 = vector.load %arg2[%c0_2, %c0_3, %c0_4] : memref<2x8x128xf32, #tpu.memory_space<vmem>>, vector<2x8x128xf32>
    %4 = vector.shape_cast %3 : vector<2x8x128xf32> to vector<16x128xf32>
    %5 = arith.truncf %4 : vector<16x128xf32> to vector<16x128xbf16>
    %c0_5 = arith.constant 0 : index
    %c0_6 = arith.constant 0 : index
    %c0_7 = arith.constant 0 : index
    %6 = vector.load %arg3[%c0_5, %c0_6, %c0_7] : memref<2x8x128xf32, #tpu.memory_space<vmem>>, vector<2x8x128xf32>
    %7 = vector.shape_cast %6 : vector<2x8x128xf32> to vector<16x128xf32>
    %8 = arith.truncf %7 : vector<16x128xf32> to vector<16x128xbf16>
    %c0_8 = arith.constant 0 : index
    %c0_9 = arith.constant 0 : index
    %9 = vector.load %arg4[%c0_8, %c0_9] : memref<128x128xbf16, #tpu.memory_space<vmem>>, vector<128x128xbf16>
    %cst = arith.constant dense<0.000000e+00> : vector<16x128xf32>
    %10 = tpu.matmul %2, %9, %cst {dimension_numbers = #tpu.dot_dimension_numbers<[1], [0], [0], [1], [0, 0, 1, 1], [], []>} : vector<16x128xbf16>, vector<128x128xbf16>, vector<16x128xf32> -> vector<16x128xf32>
    %c0_10 = arith.constant 0 : index
    %c0_11 = arith.constant 0 : index
    %11 = vector.load %arg5[%c0_10, %c0_11] : memref<128x128xbf16, #tpu.memory_space<vmem>>, vector<128x128xbf16>
    %cst_12 = arith.constant dense<0.000000e+00> : vector<16x128xf32>
    %12 = tpu.matmul %5, %11, %cst_12 {dimension_numbers = #tpu.dot_dimension_numbers<[1], [0], [0], [1], [0, 0, 1, 1], [], []>} : vector<16x128xbf16>, vector<128x128xbf16>, vector<16x128xf32> -> vector<16x128xf32>
    %c0_13 = arith.constant 0 : index
    %c0_14 = arith.constant 0 : index
    %13 = vector.load %arg6[%c0_13, %c0_14] : memref<128x128xbf16, #tpu.memory_space<vmem>>, vector<128x128xbf16>
    %cst_15 = arith.constant dense<0.000000e+00> : vector<16x128xf32>
    %14 = tpu.matmul %8, %13, %cst_15 {dimension_numbers = #tpu.dot_dimension_numbers<[1], [0], [0], [1], [0, 0, 1, 1], [], []>} : vector<16x128xbf16>, vector<128x128xbf16>, vector<16x128xf32> -> vector<16x128xf32>
    %15 = vector.shape_cast %10 : vector<16x128xf32> to vector<2x8x128xf32>
    %16 = vector.extract_strided_slice %15 {offsets = [0, 0, 0], sizes = [2, 8, 32], strides = [1, 1, 1]} : vector<2x8x128xf32> to vector<2x8x32xf32>
    %17 = vector.extract_strided_slice %15 {offsets = [0, 0, 32], sizes = [2, 8, 32], strides = [1, 1, 1]} : vector<2x8x128xf32> to vector<2x8x32xf32>
    %18 = vector.extract_strided_slice %15 {offsets = [0, 0, 64], sizes = [2, 8, 32], strides = [1, 1, 1]} : vector<2x8x128xf32> to vector<2x8x32xf32>
    %19 = vector.extract_strided_slice %15 {offsets = [0, 0, 96], sizes = [2, 8, 32], strides = [1, 1, 1]} : vector<2x8x128xf32> to vector<2x8x32xf32>
    %20 = vector.shape_cast %16 : vector<2x8x32xf32> to vector<1x2x8x32xf32>
    %21 = vector.shape_cast %17 : vector<2x8x32xf32> to vector<1x2x8x32xf32>
    %22 = vector.shape_cast %18 : vector<2x8x32xf32> to vector<1x2x8x32xf32>
    %23 = vector.shape_cast %19 : vector<2x8x32xf32> to vector<1x2x8x32xf32>
    %24 = tpu.concatenate %20, %21, %22, %23 in 0 : vector<1x2x8x32xf32>, vector<1x2x8x32xf32>, vector<1x2x8x32xf32>, vector<1x2x8x32xf32> -> vector<4x2x8x32xf32>
    %25 = vector.shape_cast %24 : vector<4x2x8x32xf32> to vector<8x8x32xf32>
    %26 = arith.truncf %25 : vector<8x8x32xf32> to vector<8x8x32xbf16>
    %27 = vector.shape_cast %12 : vector<16x128xf32> to vector<2x8x128xf32>
    %28 = vector.extract_strided_slice %27 {offsets = [0, 0, 0], sizes = [2, 8, 32], strides = [1, 1, 1]} : vector<2x8x128xf32> to vector<2x8x32xf32>
    %29 = vector.extract_strided_slice %27 {offsets = [0, 0, 32], sizes = [2, 8, 32], strides = [1, 1, 1]} : vector<2x8x128xf32> to vector<2x8x32xf32>
    %30 = vector.extract_strided_slice %27 {offsets = [0, 0, 64], sizes = [2, 8, 32], strides = [1, 1, 1]} : vector<2x8x128xf32> to vector<2x8x32xf32>
    %31 = vector.extract_strided_slice %27 {offsets = [0, 0, 96], sizes = [2, 8, 32], strides = [1, 1, 1]} : vector<2x8x128xf32> to vector<2x8x32xf32>
    %32 = vector.shape_cast %28 : vector<2x8x32xf32> to vector<1x2x8x32xf32>
    %33 = vector.shape_cast %29 : vector<2x8x32xf32> to vector<1x2x8x32xf32>
    %34 = vector.shape_cast %30 : vector<2x8x32xf32> to vector<1x2x8x32xf32>
    %35 = vector.shape_cast %31 : vector<2x8x32xf32> to vector<1x2x8x32xf32>
    %36 = tpu.concatenate %32, %33, %34, %35 in 0 : vector<1x2x8x32xf32>, vector<1x2x8x32xf32>, vector<1x2x8x32xf32>, vector<1x2x8x32xf32> -> vector<4x2x8x32xf32>
    %37 = vector.shape_cast %36 : vector<4x2x8x32xf32> to vector<8x8x32xf32>
    %38 = arith.truncf %37 : vector<8x8x32xf32> to vector<8x8x32xbf16>
    %39 = vector.shape_cast %14 : vector<16x128xf32> to vector<2x8x128xf32>
    %40 = vector.extract_strided_slice %39 {offsets = [0, 0, 0], sizes = [2, 8, 32], strides = [1, 1, 1]} : vector<2x8x128xf32> to vector<2x8x32xf32>
    %41 = vector.extract_strided_slice %39 {offsets = [0, 0, 32], sizes = [2, 8, 32], strides = [1, 1, 1]} : vector<2x8x128xf32> to vector<2x8x32xf32>
    %42 = vector.extract_strided_slice %39 {offsets = [0, 0, 64], sizes = [2, 8, 32], strides = [1, 1, 1]} : vector<2x8x128xf32> to vector<2x8x32xf32>
    %43 = vector.extract_strided_slice %39 {offsets = [0, 0, 96], sizes = [2, 8, 32], strides = [1, 1, 1]} : vector<2x8x128xf32> to vector<2x8x32xf32>
    %44 = vector.shape_cast %40 : vector<2x8x32xf32> to vector<1x2x8x32xf32>
    %45 = vector.shape_cast %41 : vector<2x8x32xf32> to vector<1x2x8x32xf32>
    %46 = vector.shape_cast %42 : vector<2x8x32xf32> to vector<1x2x8x32xf32>
    %47 = vector.shape_cast %43 : vector<2x8x32xf32> to vector<1x2x8x32xf32>
    %48 = tpu.concatenate %44, %45, %46, %47 in 0 : vector<1x2x8x32xf32>, vector<1x2x8x32xf32>, vector<1x2x8x32xf32>, vector<1x2x8x32xf32> -> vector<4x2x8x32xf32>
    %49 = vector.shape_cast %48 : vector<4x2x8x32xf32> to vector<8x8x32xf32>
    %50 = arith.truncf %49 : vector<8x8x32xf32> to vector<8x8x32xbf16>
    "tpu.trace_start"() <{level = 10 : i32, message = "nqd,nkd->nqk"}> : () -> ()
    %cst_16 = arith.constant dense<0.000000e+00> : vector<8x8x8xf32>
    %51 = tpu.matmul %26, %38, %cst_16 {dimension_numbers = #tpu.dot_dimension_numbers<[2], [2], [1], [1], [0, 0, 0, 1, 1, 1], [0], [0]>} : vector<8x8x32xbf16>, vector<8x8x32xbf16>, vector<8x8x8xf32> -> vector<8x8x8xf32>
    "tpu.trace_stop"() : () -> ()
    %cst_17 = arith.constant dense<0xFF800000> : vector<8x8xf32>
    %52 = vector.multi_reduction <maximumf>, %51, %cst_17 [2] : vector<8x8x8xf32> to vector<8x8xf32>
    %53 = vector.shape_cast %52 : vector<8x8xf32> to vector<8x8x1xf32>
    %54 = vector.broadcast %53 : vector<8x8x1xf32> to vector<8x8x8xf32>
    %55 = arith.subf %51, %54 : vector<8x8x8xf32>
    %56 = math.exp %55 : vector<8x8x8xf32>
    %cst_18 = arith.constant dense<0.000000e+00> : vector<8x8xf32>
    %57 = vector.multi_reduction <add>, %56, %cst_18 [2] : vector<8x8x8xf32> to vector<8x8xf32>
    %58 = vector.shape_cast %57 : vector<8x8xf32> to vector<8x8x1xf32>
    %59 = vector.broadcast %58 : vector<8x8x1xf32> to vector<8x8x8xf32>
    %60 = arith.divf %56, %59 : vector<8x8x8xf32>
    %61 = arith.truncf %60 : vector<8x8x8xf32> to vector<8x8x8xbf16>
    "tpu.trace_start"() <{level = 10 : i32, message = "nqk,nkd->nqd"}> : () -> ()
    %cst_19 = arith.constant dense<0.000000e+00> : vector<8x8x32xf32>
    %62 = tpu.matmul %61, %50, %cst_19 {dimension_numbers = #tpu.dot_dimension_numbers<[2], [1], [1], [2], [0, 0, 0, 1, 1, 2], [0], [0]>} : vector<8x8x8xbf16>, vector<8x8x32xbf16>, vector<8x8x32xf32> -> vector<8x8x32xf32>
    "tpu.trace_stop"() : () -> ()
    %63 = vector.shape_cast %62 : vector<8x8x32xf32> to vector<4x2x8x32xf32>
    %64 = vector.extract_strided_slice %63 {offsets = [0, 0, 0, 0], sizes = [1, 2, 8, 32], strides = [1, 1, 1, 1]} : vector<4x2x8x32xf32> to vector<1x2x8x32xf32>
    %65 = vector.shape_cast %64 : vector<1x2x8x32xf32> to vector<2x8x32xf32>
    %66 = vector.shape_cast %65 : vector<2x8x32xf32> to vector<16x32xf32>
    %67 = vector.extract_strided_slice %63 {offsets = [1, 0, 0, 0], sizes = [1, 2, 8, 32], strides = [1, 1, 1, 1]} : vector<4x2x8x32xf32> to vector<1x2x8x32xf32>
    %68 = vector.shape_cast %67 : vector<1x2x8x32xf32> to vector<2x8x32xf32>
    %69 = vector.shape_cast %68 : vector<2x8x32xf32> to vector<16x32xf32>
    %70 = vector.extract_strided_slice %63 {offsets = [2, 0, 0, 0], sizes = [1, 2, 8, 32], strides = [1, 1, 1, 1]} : vector<4x2x8x32xf32> to vector<1x2x8x32xf32>
    %71 = vector.shape_cast %70 : vector<1x2x8x32xf32> to vector<2x8x32xf32>
    %72 = vector.shape_cast %71 : vector<2x8x32xf32> to vector<16x32xf32>
    %73 = vector.extract_strided_slice %63 {offsets = [3, 0, 0, 0], sizes = [1, 2, 8, 32], strides = [1, 1, 1, 1]} : vector<4x2x8x32xf32> to vector<1x2x8x32xf32>
    %74 = vector.shape_cast %73 : vector<1x2x8x32xf32> to vector<2x8x32xf32>
    %75 = vector.shape_cast %74 : vector<2x8x32xf32> to vector<16x32xf32>
    %76 = tpu.concatenate %66, %69, %72, %75 in 1 : vector<16x32xf32>, vector<16x32xf32>, vector<16x32xf32>, vector<16x32xf32> -> vector<16x128xf32>
    %77 = arith.truncf %76 : vector<16x128xf32> to vector<16x128xbf16>
    %c0_20 = arith.constant 0 : index
    %c0_21 = arith.constant 0 : index
    %78 = vector.load %arg7[%c0_20, %c0_21] : memref<128x128xbf16, #tpu.memory_space<vmem>>, vector<128x128xbf16>
    %cst_22 = arith.constant dense<0.000000e+00> : vector<16x128xf32>
    %79 = tpu.matmul %77, %78, %cst_22 {dimension_numbers = #tpu.dot_dimension_numbers<[1], [0], [0], [1], [0, 0, 1, 1], [], []>} : vector<16x128xbf16>, vector<128x128xbf16>, vector<16x128xf32> -> vector<16x128xf32>
    %80 = vector.shape_cast %79 : vector<16x128xf32> to vector<2x8x128xf32>
    %c0_23 = arith.constant 0 : index
    %c0_24 = arith.constant 0 : index
    %c0_25 = arith.constant 0 : index
    %81 = vector.load %arg8[%c0_23, %c0_24, %c0_25] : memref<2x8x128xf32, #tpu.memory_space<vmem>>, vector<2x8x128xf32>
    tpu.vector_store %arg8[%c0_23, %c0_24, %c0_25], %80 {strides = array<i32>} : memref<2x8x128xf32, #tpu.memory_space<vmem>>, vector<2x8x128xf32>,
    return
  }
  func.func @transform_0(%arg0: i32) -> (i32, i32, i32) {
    %c0_i32 = arith.constant 0 : i32
    %c0_i32_0 = arith.constant 0 : i32
    %c0_i32_1 = arith.constant 0 : i32
    %c0_i32_2 = arith.constant 0 : i32
    return %c0_i32, %c0_i32_0, %c0_i32_1 : i32, i32, i32
  }
  func.func @transform_1(%arg0: i32) -> (i32, i32, i32) {
    %c0_i32 = arith.constant 0 : i32
    %c0_i32_0 = arith.constant 0 : i32
    %c0_i32_1 = arith.constant 0 : i32
    %c0_i32_2 = arith.constant 0 : i32
    return %c0_i32, %c0_i32_0, %c0_i32_1 : i32, i32, i32
  }
  func.func @transform_2(%arg0: i32) -> (i32, i32, i32) {
    %c0_i32 = arith.constant 0 : i32
    %c0_i32_0 = arith.constant 0 : i32
    %c0_i32_1 = arith.constant 0 : i32
    %c0_i32_2 = arith.constant 0 : i32
    return %c0_i32, %c0_i32_0, %c0_i32_1 : i32, i32, i32
  }
  func.func @transform_3(%arg0: i32) -> (i32, i32) {
    %c0_i32 = arith.constant 0 : i32
    %c0_i32_0 = arith.constant 0 : i32
    %c0_i32_1 = arith.constant 0 : i32
    return %c0_i32, %c0_i32_0 : i32, i32
  }
  func.func @transform_4(%arg0: i32) -> (i32, i32) {
    %c0_i32 = arith.constant 0 : i32
    %c0_i32_0 = arith.constant 0 : i32
    %c0_i32_1 = arith.constant 0 : i32
    return %c0_i32, %c0_i32_0 : i32, i32
  }
  func.func @transform_5(%arg0: i32) -> (i32, i32) {
    %c0_i32 = arith.constant 0 : i32
    %c0_i32_0 = arith.constant 0 : i32
    %c0_i32_1 = arith.constant 0 : i32
    return %c0_i32, %c0_i32_0 : i32, i32
  }
  func.func @transform_6(%arg0: i32) -> (i32, i32) {
    %c0_i32 = arith.constant 0 : i32
    %c0_i32_0 = arith.constant 0 : i32
    %c0_i32_1 = arith.constant 0 : i32
    return %c0_i32, %c0_i32_0 : i32, i32
  }
  func.func @transform_7(%arg0: i32) -> (i32, i32, i32) {
    %c0_i32 = arith.constant 0 : i32
    %c0_i32_0 = arith.constant 0 : i32
    %c0_i32_1 = arith.constant 0 : i32
    %c0_i32_2 = arith.constant 0 : i32
    return %c0_i32, %c0_i32_0, %c0_i32_1 : i32, i32, i32
  }
}

</mosaic_0001>

<bundles_post_ra>
// kernel: tpu_custom_call.1
= control target key start
LH: loop header
LB: loop body
LE: loop exit
PB: predicated region body
PF: predicated region fallthrough
CT: control target
= control target key end

     0   :  { %12 = vsyncpa [#allocation3], 0  ;;  %s2538_s0 = inlined_call_operand.hbm [shape: f32[2,8,128], index: 0, kind: input, shape index: {}]   ;;  %s2539_s1 = inlined_call_operand.hbm [shape: f32[2,8,128], index: 1, kind: input, shape index: {}]   ;;  %s2540_s2 = inlined_call_operand.hbm [shape: f32[2,8,128], index: 2, kind: input, shape index: {}]   ;;  %s2541_s3 = inlined_call_operand.hbm [shape: bf16[128,128], index: 3, kind: input, shape index: {}]   ;;  %s2542_s4 = inlined_call_operand.hbm [shape: bf16[128,128], index: 4, kind: input, shape index: {}]   ;;  %s2543_s5 = inlined_call_operand.hbm [shape: bf16[128,128], index: 5, kind: input, shape index: {}]   ;;  %s2544_s6 = inlined_call_operand.hbm [shape: bf16[128,128], index: 6, kind: input, shape index: {}]   ;;  %s2545_s7 = inlined_call_operand.hbm [shape: f32[2,8,128], index: 7, kind: output, shape index: {}]  }
   0x1   :  { %13 = vsyncpa [#allocation6], 0 }
   0x2   :  { %14 = vsyncpa [#allocation9], 0 }
   0x3   :  { %15 = vsyncpa [#allocation12], 0 }
   0x4   :  { %16 = vsyncpa [#allocation4], 0  ;;  %s2129_s24 = smov [#allocation5]   ;;  %s2130_s26 = smov [#allocation8]  }
   0x5   :  { %s34_s25 = sshll.u32 %s2129_s24, 4  ;;  %s58_s27 = sshll.u32 %s2130_s26, 4  ;;  %s35_s25 = int_to_ptr.vmem [resolvable:$true] %s34_s25  ;;  %s2185_s27 = int_to_ptr.vmem [resolvable:$true] %s58_s27 }
   0x6   :  { %s1943_s30 = scalar_lea.hbm %s2539_s1, 256 }
   0x7   :  { %p1944_p0 = scmp.ne.s32.totalorder %s2539_s1, %s1943_s30  ;;  %p1947_p1 = scmp.lt.u32.totalorder %s1943_s30, %s2539_s1 }
   0x9   :  { %p1949_p2 = pnand %p1947_p1, %p1944_p0 }
   0xb   :  { %1952 = shalt.err (!%p1949_p2)
}
   0xc   :  { %s1953_s12 = scalar_lea.vmem %s35_s25, 256  ;;  %p1958_p4 = scmp.lt.s32.totalorder %s35_s25, %s35_s25 }
   0xd   :  { %p1954_p3 = scmp.ne.s32.totalorder %s35_s25, %s1953_s12  ;;  %p1959_p5 = scmp.lt.s32.totalorder %s1953_s12, %s1953_s12 }
   0xf   :  { %p1960_p6 = por %p1959_p5, %p1958_p4 }
  0x11   :  { %p1961_p7 = pnand %p1960_p6, %p1954_p3 }
  0x13   :  { %1964 = shalt.err (!%p1961_p7)
}
  0x14   :  { %s2131_s13 = smov 128   ;;  %s2132_s14 = smov 8  }
  0x15   :  { %40 = dma.hbm_to_vmem [thread:$0]  %s2539_s1, 256, %s35_s25, [#allocation6], %s2131_s13, %s2131_s13, %s2132_s14  }
  0x16   :  { %s1965_s19 = scalar_lea.hbm %s2541_s3, 1024 }
  0x17   :  { %p1966_p8 = scmp.ne.s32.totalorder %s2541_s3, %s1965_s19  ;;  %p1969_p9 = scmp.lt.u32.totalorder %s1965_s19, %s2541_s3 }
  0x19   :  { %p1971_p10 = pnand %p1969_p9, %p1966_p8 }
  0x1b   :  { %1974 = shalt.err (!%p1971_p10)
}
  0x1c   :  { %s1975_s24 = scalar_lea.vmem %s2185_s27, 1024  ;;  %p1980_p12 = scmp.lt.s32.totalorder %s2185_s27, %s2185_s27 }
  0x1d   :  { %p1976_p11 = scmp.ne.s32.totalorder %s2185_s27, %s1975_s24  ;;  %p1981_p13 = scmp.lt.s32.totalorder %s1975_s24, %s1975_s24 }
  0x1f   :  { %p1982_p0 = por %p1981_p13, %p1980_p12 }
  0x21   :  { %p1983_p1 = pnand %p1982_p0, %p1976_p11 }
  0x23   :  { %1986 = shalt.err (!%p1983_p1)
}
  0x24   :  { %s2133_s1 = smov 64   ;;  %s2134_s25 = smov 4  }
  0x25   :  { %64 = dma.hbm_to_vmem [thread:$0]  %s2541_s3, 1024, %s2185_s27, [#allocation9], %s2133_s1, %s2133_s1, %s2134_s25  }
  0x26   :  { %s2135_s29 = smov [#allocation11]   ;;  %s2136_s8 = smov [#allocation2]  }
  0x27   :  { %s82_s30 = sshll.u32 %s2135_s29, 4  ;;  %s22_s9 = sshll.u32 %s2136_s8, 4  ;;  %s83_s30 = int_to_ptr.vmem [resolvable:$true] %s82_s30  ;;  %s2222_s9 = int_to_ptr.vmem [resolvable:$true] %s22_s9 }
  0x28   :  { %s1987_s12 = scalar_lea.hbm %s2543_s5, 1024 }
  0x29   :  { %p1988_p2 = scmp.ne.s32.totalorder %s2543_s5, %s1987_s12  ;;  %p1991_p3 = scmp.lt.u32.totalorder %s1987_s12, %s2543_s5 }
  0x2b   :  { %p1993_p4 = pnand %p1991_p3, %p1988_p2 }
  0x2d   :  { %1996 = shalt.err (!%p1993_p4)
}
  0x2e   :  { %s1997_s3 = scalar_lea.vmem %s83_s30, 1024  ;;  %p2002_p6 = scmp.lt.s32.totalorder %s83_s30, %s83_s30 }
  0x2f   :  { %p1998_p5 = scmp.ne.s32.totalorder %s83_s30, %s1997_s3  ;;  %p2003_p7 = scmp.lt.s32.totalorder %s1997_s3, %s1997_s3 }
  0x31   :  { %p2004_p8 = por %p2003_p7, %p2002_p6 }
  0x33   :  { %p2005_p9 = pnand %p2004_p8, %p1998_p5 }
  0x35   :  { %2008 = shalt.err (!%p2005_p9)
}
  0x36   :  { %88 = dma.hbm_to_vmem [thread:$0]  %s2543_s5, 1024, %s83_s30, [#allocation12], %s2133_s1, %s2133_s1, %s2134_s25  }
  0x37   :  { %s2009_s22 = scalar_lea.hbm %s2538_s0, 256 }
  0x38   :  { %p2010_p10 = scmp.ne.s32.totalorder %s2538_s0, %s2009_s22  ;;  %p2013_p11 = scmp.lt.u32.totalorder %s2009_s22, %s2538_s0 }
  0x3a   :  { %p2015_p12 = pnand %p2013_p11, %p2010_p10 }
  0x3c   :  { %2018 = shalt.err (!%p2015_p12)
}
  0x3d   :  { %s2019_s29 = scalar_lea.vmem %s2222_s9, 256  ;;  %p2024_p0 = scmp.lt.s32.totalorder %s2222_s9, %s2222_s9 }
  0x3e   :  { %p2020_p13 = scmp.ne.s32.totalorder %s2222_s9, %s2019_s29  ;;  %p2025_p1 = scmp.lt.s32.totalorder %s2019_s29, %s2019_s29 }
  0x40   :  { %p2026_p2 = por %p2025_p1, %p2024_p0 }
  0x42   :  { %p2027_p3 = pnand %p2026_p2, %p2020_p13 }
  0x44   :  { %2030 = shalt.err (!%p2027_p3)
}
  0x45   :  { %28 = dma.hbm_to_vmem [thread:$0]  %s2538_s0, 256, %s2222_s9, [#allocation3], %s2131_s13, %s2131_s13, %s2132_s14  }
  0x46   :  { %s2137_s8 = smov [#allocation7]   ;;  %s2138_s11 = smov [#allocation10]  }
  0x47   :  { %s46_s10 = sshll.u32 %s2137_s8, 4  ;;  %s70_s12 = sshll.u32 %s2138_s11, 4  ;;  %s47_s10 = int_to_ptr.vmem [resolvable:$true] %s46_s10  ;;  %s2259_s12 = int_to_ptr.vmem [resolvable:$true] %s70_s12 }
  0x48   :  { %s2031_s17 = scalar_lea.hbm %s2540_s2, 256 }
  0x49   :  { %p2032_p4 = scmp.ne.s32.totalorder %s2540_s2, %s2031_s17  ;;  %p2035_p5 = scmp.lt.u32.totalorder %s2031_s17, %s2540_s2 }
  0x4b   :  { %p2037_p6 = pnand %p2035_p5, %p2032_p4 }
  0x4d   :  { %2040 = shalt.err (!%p2037_p6)
}
  0x4e   :  { %s2041_s0 = scalar_lea.vmem %s47_s10, 256  ;;  %p2046_p8 = scmp.lt.s32.totalorder %s47_s10, %s47_s10 }
  0x4f   :  { %p2042_p7 = scmp.ne.s32.totalorder %s47_s10, %s2041_s0  ;;  %p2047_p9 = scmp.lt.s32.totalorder %s2041_s0, %s2041_s0 }
  0x51   :  { %p2048_p10 = por %p2047_p9, %p2046_p8 }
  0x53   :  { %p2049_p11 = pnand %p2048_p10, %p2042_p7 }
  0x55   :  { %2052 = shalt.err (!%p2049_p11)
}
  0x56   :  { %52 = dma.hbm_to_vmem [thread:$0]  %s2540_s2, 256, %s47_s10, [#allocation6], %s2131_s13, %s2131_s13, %s2132_s14  }
  0x57   :  { %s2053_s23 = scalar_lea.hbm %s2542_s4, 1024 }
  0x58   :  { %p2054_p12 = scmp.ne.s32.totalorder %s2542_s4, %s2053_s23  ;;  %p2057_p13 = scmp.lt.u32.totalorder %s2053_s23, %s2542_s4 }
  0x5a   :  { %p2059_p0 = pnand %p2057_p13, %p2054_p12 }
  0x5c   :  { %2062 = shalt.err (!%p2059_p0)
}
  0x5d   :  { %s2063_s5 = scalar_lea.vmem %s2259_s12, 1024  ;;  %p2068_p2 = scmp.lt.s32.totalorder %s2259_s12, %s2259_s12 }
  0x5e   :  { %p2064_p1 = scmp.ne.s32.totalorder %s2259_s12, %s2063_s5  ;;  %p2069_p3 = scmp.lt.s32.totalorder %s2063_s5, %s2063_s5 }
  0x60   :  { %p2070_p4 = por %p2069_p3, %p2068_p2 }
  0x62   :  { %p2071_p5 = pnand %p2070_p4, %p2064_p1 }
  0x64   :  { %2074 = shalt.err (!%p2071_p5)
}
  0x65   :  { %76 = dma.hbm_to_vmem [thread:$0]  %s2542_s4, 1024, %s2259_s12, [#allocation9], %s2133_s1, %s2133_s1, %s2134_s25  }
  0x66   :  { %s2139_s8 = smov [#allocation13]   ;;  %s2075_s16 = scalar_lea.hbm %s2544_s6, 1024 }
  0x67   :  { %s94_s10 = sshll.u32 %s2139_s8, 4  ;;  %p2076_p6 = scmp.ne.s32.totalorder %s2544_s6, %s2075_s16  ;;  %s95_s10 = int_to_ptr.vmem [resolvable:$true] %s94_s10 }
  0x68   :  { %p2079_p7 = scmp.lt.u32.totalorder %s2075_s16, %s2544_s6 }
  0x6a   :  { %p2081_p8 = pnand %p2079_p7, %p2076_p6 }
  0x6c   :  { %2084 = shalt.err (!%p2081_p8)
}
  0x6d   :  { %s2085_s19 = scalar_lea.vmem %s95_s10, 1024  ;;  %p2090_p10 = scmp.lt.s32.totalorder %s95_s10, %s95_s10 }
  0x6e   :  { %p2086_p9 = scmp.ne.s32.totalorder %s95_s10, %s2085_s19  ;;  %p2091_p11 = scmp.lt.s32.totalorder %s2085_s19, %s2085_s19 }
  0x70   :  { %p2092_p12 = por %p2091_p11, %p2090_p10 }
  0x72   :  { %p2093_p13 = pnand %p2092_p12, %p2086_p9 }
  0x74   :  { %2096 = shalt.err (!%p2093_p13)
}
  0x75   :  { %100 = dma.hbm_to_vmem [thread:$0]  %s2544_s6, 1024, %s95_s10, [#allocation12], %s2133_s1, %s2133_s1, %s2134_s25  }
  0x76   :  { %2119 = dma.done.wait [#allocation3], 256  }
  0x77   :  { %2120 = vsyncadd [#allocation3], 4294967040 }
  0x78   :  { %2121 = dma.done.wait [#allocation6], 512  }
  0x79   :  { %2122 = vsyncadd [#allocation6], 4294966784 }
  0x7a   :  { %2123 = dma.done.wait [#allocation9], 2048  }
  0x7b   :  { %2124 = vsyncadd [#allocation9], 4294965248 }
  0x7c   :  { %2125 = dma.done.wait [#allocation12], 2048  }
  0x7d   :  { %2126 = vsyncadd [#allocation12], 4294965248  ;;  %v2140_v0 = vmov 0.0   ;;  %vm2141_vm0 = vmmov 0   ;;  %v1879_v1 = vld [vmem:[#allocation8] sm:$0xff]   ;;  %v1881_v3 = vld [vmem:[#allocation8 + $0x8] sm:$0xff]  }
  0x7e   :  { %1642 = vmatprep.subr.bf16.mxu0 %v2140_v0  ;;  %1662 = vmatprep.subr.bf16.mxu1 %v2140_v0  ;;  %v1880_v2 = vld [vmem:[#allocation10] sm:$0xff]   ;;  %v1882_v4 = vld [vmem:[#allocation10 + $0x8] sm:$0xff]   ;;  %v1883_v5 = vld [vmem:[#allocation8 + $0x10] sm:$0xff]   ;;  %vm531_vm1 = vcmask 261120   ;;  %s2142_s6 = smov 96   ;;  %s2143_s25 = smov 32  }
  0x7f   :  { %1658 = vmatprep.mubr.msk.bf16.mxu0 %vm2141_vm0, %v2140_v0  ;;  %1678 = vmatprep.mubr.msk.bf16.mxu1 %vm2141_vm0, %v2140_v0  ;;  %v1884_v6 = vld [vmem:[#allocation10 + $0x10] sm:$0xff]   ;;  %v1885_v7 = vld [vmem:[#allocation8 + $0x18] sm:$0xff]   ;;  %v1887_v9 = vld [vmem:[#allocation8 + $0x20] sm:$0xff]   ;;  %vm900_vm2 = vcmask 64512   ;;  %vm1000_vm3 = vcmask 1043456   ;;  %vm1392_vm4 = vcmask 523264  }
  0x80   :  { %1643 = vmatpush3.bf16.msra.mxu0 %v1879_v1  ;;  %1663 = vmatpush3.bf16.msra.mxu1 %v1880_v2  ;;  %v1886_v8 = vld [vmem:[#allocation10 + $0x18] sm:$0xff]   ;;  %v1888_v10 = vld [vmem:[#allocation10 + $0x20] sm:$0xff]   ;;  %v1889_v11 = vld [vmem:[#allocation8 + $0x28] sm:$0xff]   ;;  %vm1395_vm5 = vcmask 785408  }
  0x81   :  { %1644 = vmatprep.subr.bf16.mxu0 %v2140_v0  ;;  %1664 = vmatprep.subr.bf16.mxu1 %v2140_v0  ;;  %v1890_v12 = vld [vmem:[#allocation10 + $0x28] sm:$0xff]   ;;  %v1891_v13 = vld [vmem:[#allocation8 + $0x30] sm:$0xff]   ;;  %v1893_v15 = vld [vmem:[#allocation8 + $0x38] sm:$0xff]  }
  0x82   :  { %v1892_v14 = vld [vmem:[#allocation10 + $0x30] sm:$0xff]   ;;  %v124_v17 = vld [vmem:[#allocation2 + $0x8] sm:$0xff]  ;;  %v126_v19 = vld [vmem:[#allocation5] sm:$0xff] }
  0x83   :  { %v123_v16 = vld [vmem:[#allocation2] sm:$0xff]  ;;  %v1894_v18 = vld [vmem:[#allocation10 + $0x38] sm:$0xff]   ;;  %v127_v20 = vld [vmem:[#allocation5 + $0x8] sm:$0xff] }
  0x84   :  { %1645 = vmatpush3.bf16.msra.mxu0 %v1881_v3  ;;  %1665 = vmatpush3.bf16.msra.mxu1 %v1882_v4  ;;  %v125_v21 = vpack.c.bf16 %v124_v17, %v123_v16  ;;  %v128_v22 = vpack.c.bf16 %v127_v20, %v126_v19  ;;  %v1895_v38 = vld [vmem:[#allocation11] sm:$0xff]   ;;  %v1896_v39 = vld [vmem:[#allocation11 + $0x8] sm:$0xff]   ;;  %v1897_v40 = vld [vmem:[#allocation11 + $0x10] sm:$0xff]  }
  0x85   :  { %1646 = vmatprep.subr.bf16.mxu0 %v2140_v0  ;;  %1666 = vmatprep.subr.bf16.mxu1 %v2140_v0  ;;  %v1898_v42 = vld [vmem:[#allocation11 + $0x18] sm:$0xff]   ;;  %v1899_v46 = vld [vmem:[#allocation11 + $0x20] sm:$0xff]   ;;  %v1900_v52 = vld [vmem:[#allocation11 + $0x28] sm:$0xff]  }
  0x86   :  { %v1901_v55 = vld [vmem:[#allocation11 + $0x30] sm:$0xff]   ;;  %v1902_v59 = vld [vmem:[#allocation11 + $0x38] sm:$0xff]  }
  0x87   :  { %v129_v60 = vld [vmem:[#allocation7] sm:$0xff]  ;;  %v130_v61 = vld [vmem:[#allocation7 + $0x8] sm:$0xff] }
  0x88   :  { %1647 = vmatpush3.bf16.msra.mxu0 %v1883_v5  ;;  %1667 = vmatpush3.bf16.msra.mxu1 %v1884_v6  ;;  %v131_v1 = vpack.c.bf16 %v130_v61, %v129_v60 }
  0x89   :  { %1648 = vmatprep.subr.bf16.mxu0 %v2140_v0  ;;  %1668 = vmatprep.subr.bf16.mxu1 %v2140_v0 }
  0x8c   :  { %1649 = vmatpush3.bf16.msra.mxu0 %v1885_v7  ;;  %1669 = vmatpush3.bf16.msra.mxu1 %v1886_v8 }
  0x8d   :  { %1650 = vmatprep.subr.bf16.mxu0 %v2140_v0  ;;  %1670 = vmatprep.subr.bf16.mxu1 %v2140_v0 }
  0x90   :  { %1651 = vmatpush3.bf16.msra.mxu0 %v1887_v9  ;;  %1671 = vmatpush3.bf16.msra.mxu1 %v1888_v10 }
  0x91   :  { %1652 = vmatprep.subr.bf16.mxu0 %v2140_v0  ;;  %1672 = vmatprep.subr.bf16.mxu1 %v2140_v0 }
  0x94   :  { %1653 = vmatpush3.bf16.msra.mxu0 %v1889_v11  ;;  %1673 = vmatpush3.bf16.msra.mxu1 %v1890_v12 }
  0x95   :  { %1654 = vmatprep.subr.bf16.mxu0 %v2140_v0  ;;  %1674 = vmatprep.subr.bf16.mxu1 %v2140_v0 }
  0x98   :  { %1655 = vmatpush3.bf16.msra.mxu0 %v1891_v13  ;;  %1675 = vmatpush3.bf16.msra.mxu1 %v1892_v14 }
  0x99   :  { %1656 = vmatprep.subr.bf16.mxu0 %v2140_v0  ;;  %1676 = vmatprep.subr.bf16.mxu1 %v2140_v0 }
  0x9c   :  { %1657 = vmatpush3.bf16.msra.mxu0 %v1893_v15  ;;  %1677 = vmatpush3.bf16.msra.mxu1 %v1894_v18 }
  0x9d   :  { %1682 = vmatprep.subr.bf16.mxu0 %v2140_v0  ;;  %1702 = vmatprep.subr.bf16.mxu1 %v2140_v0 }
  0x9f   :  { %1659 = vmatmul.mubr.bf16.vlgmr.msra.gmra.mrb[0].mxu0 %v125_v21  ;;  %1679 = vmatmul.mubr.bf16.vlgmr.msra.gmra.mrb[0].mxu1 %v128_v22 }
  0xa0   :  { %1698 = vmatprep.mubr.msk.bf16.mxu0 %vm2141_vm0, %v2140_v0  ;;  %1704 = vmatprep.mubr.msk.bf16.mxu1 %vm2141_vm0, %v2140_v0 }
  0xa1   :  { %1683 = vmatpush3.bf16.msra.mxu0 %v1895_v38 }
  0xa2   :  { %1684 = vmatprep.subr.bf16.mxu0 %v2140_v0 }
  0xa5   :  { %1685 = vmatpush3.bf16.msra.mxu0 %v1896_v39 }
  0xa6   :  { %1686 = vmatprep.subr.bf16.mxu0 %v2140_v0 }
  0xa9   :  { %1687 = vmatpush3.bf16.msra.mxu0 %v1897_v40 }
  0xaa   :  { %1688 = vmatprep.subr.bf16.mxu0 %v2140_v0 }
  0xad   :  { %1689 = vmatpush3.bf16.msra.mxu0 %v1898_v42 }
  0xae   :  { %1690 = vmatprep.subr.bf16.mxu0 %v2140_v0 }
  0xb1   :  { %1691 = vmatpush3.bf16.msra.mxu0 %v1899_v46 }
  0xb2   :  { %1692 = vmatprep.subr.bf16.mxu0 %v2140_v0 }
  0xb5   :  { %1693 = vmatpush3.bf16.msra.mxu0 %v1900_v52 }
  0xb6   :  { %1694 = vmatprep.subr.bf16.mxu0 %v2140_v0 }
  0xb9   :  { %1695 = vmatpush3.bf16.msra.mxu0 %v1901_v55 }
  0xba   :  { %1696 = vmatprep.subr.bf16.mxu0 %v2140_v0 }
  0xbd   :  { %1697 = vmatpush3.bf16.msra.mxu0 %v1902_v59 }
  0xbe   :  { %1750 = vmatprep.subr.bf16.mxu0 %v2140_v0 }
  0xc0   :  { %1699 = vmatmul.mubr.bf16.vlgmr.msra.gmra.mrb[4].mxu0 %v131_v1 }
  0xc1   :  { %1752 = vmatprep.mubr.msk.bf16.mxu0 %vm2141_vm0, %v2140_v0 }
 0x172   :  { %v230_v23 = vpop.f32.mrb[0].mxu0  ;;  %v335_v24 = vpop.f32.mrb[0].mxu1 }
 0x173   :  { %v1660_v25 = vpop.f32.mrb[1].mxu0  ;;  %477 = vrot.lane.b32.xlu0 %v335_v24, %s2142_s6  ;;  %v1680_v26 = vpop.f32.mrb[1].mxu1  ;;  %v495_v28 = vpack.c.bf16 %v335_v24, %v335_v24  ;;  %v467_v35 = vpack.c.bf16 %v230_v23, %v230_v23 }
 0x174   :  { %v233_v27 = vpop.f32.mrb[2].mxu0  ;;  %v338_v29 = vpop.f32.mrb[2].mxu1 }
 0x175   :  { %451 = vrot.lane.b32.xlu1 %v233_v27, %s2142_s6  ;;  %v1661_v30 = vpop.f32.mrb[3].mxu0  ;;  %v1681_v31 = vpop.f32.mrb[3].mxu1  ;;  %v536_v32 = vsel %vm531_vm1, %v495_v28, 0  ;;  %v1834_v33 = vpack.i.bf16 %v338_v29, %v230_v23  ;;  %v496_v34 = vpack.c.bf16 %v338_v29, %v338_v29  ;;  %v468_v37 = vpack.c.bf16 %v233_v27, %v233_v27 }
 0x176   :  { %1703 = vmatpush3.bf16.xpose.msra.mxu1 %v536_v32 }
 0x177   :  { %1835 = vrot.lane.b32.xlu0 %v1834_v33, %s2142_s6  ;;  %1708 = vmatprep.subr.bf16.mxu1 %v2140_v0  ;;  %v582_v36 = vsel %vm531_vm1, %v496_v34, 0 }
 0x179   :  { %483 = vrot.lane.b32.xlu1 %v335_v24, %s2133_s1 }
 0x17b   :  { %1840 = vrot.lane.b32.xlu0 %v1834_v33, %s2133_s1 }
 0x17d   :  { %457 = vrot.lane.b32.xlu1 %v233_v27, %s2133_s1  ;;  %1705 = vmatmul.mubr.msk.bf16.vlgmr.msra.gmra.mrb[4].mxu1 %vm531_vm1, %v467_v35 }
 0x17e   :  { %1709 = vmatpush3.bf16.xpose.msra.mxu1 %v582_v36  ;;  %1710 = vmatprep.mubr.msk.bf16.mxu1 %vm2141_vm0, %v2140_v0 }
 0x17f   :  { %489 = vrot.lane.b32.xlu0 %v335_v24, %s2143_s25  ;;  %1714 = vmatprep.subr.bf16.mxu1 %v2140_v0 }
 0x181   :  { %1845 = vrot.lane.b32.xlu1 %v1834_v33, %s2143_s25 }
 0x183   :  { %463 = vrot.lane.b32.xlu0 %v233_v27, %s2143_s25 }
 0x185   :  { %1711 = vmatmul.mubr.msk.bf16.vlgmr.msra.gmra.mrb[8].mxu1 %vm531_vm1, %v468_v37 }
 0x186   :  { %1716 = vmatprep.mubr.msk.bf16.mxu1 %vm2141_vm0, %v2140_v0 }
 0x1e5   :  { %v478_v41 = vpop.permute.xlu0 %477 }
 0x1e6   :  { %v497_v43 = vpack.c.bf16 %v478_v41, %v478_v41 }
 0x1e7   :  { %v452_v49 = vpop.permute.xlu1 %451 }
 0x1e8   :  { %v628_v44 = vsel %vm531_vm1, %v497_v43, 0  ;;  %v470_v58 = vpack.c.bf16 %v452_v49, %v452_v49 }
 0x1e9   :  { %v1836_v45 = vpop.permute.xlu0 %1835  ;;  %1715 = vmatpush3.bf16.xpose.msra.mxu1 %v628_v44 }
 0x1ea   :  { %v1838_v47 = vunpack.i.h.bf16 %v1836_v45  ;;  %v1837_v48 = vunpack.i.l.bf16 %v1836_v45  ;;  %1720 = vmatprep.subr.bf16.mxu1 %v2140_v0 }
 0x1eb   :  { %v484_v54 = vpop.permute.xlu1 %483 }
 0x1ec   :  { %v498_v50 = vpack.c.bf16 %v1838_v47, %v1838_v47  ;;  %v469_v51 = vpack.c.bf16 %v1837_v48, %v1837_v48  ;;  %v499_v56 = vpack.c.bf16 %v484_v54, %v484_v54 }
 0x1ed   :  { %v1841_v57 = vpop.permute.xlu0 %1840 }
 0x1ee   :  { %v674_v53 = vsel %vm531_vm1, %v498_v50, 0  ;;  %v720_v62 = vsel %vm531_vm1, %v499_v56, 0  ;;  %v1843_v63 = vunpack.i.h.bf16 %v1841_v57  ;;  %v1842_v2 = vunpack.i.l.bf16 %v1841_v57 }
 0x1ef   :  { %v458_v5 = vpop.permute.xlu1 %457 }
 0x1f0   :  { %1717 = vmatmul.mubr.msk.bf16.vlgmr.msra.gmra.mrb[12].mxu1 %vm531_vm1, %v469_v51  ;;  %v500_v3 = vpack.c.bf16 %v1843_v63, %v1843_v63  ;;  %v471_v4 = vpack.c.bf16 %v1842_v2, %v1842_v2  ;;  %v472_v10 = vpack.c.bf16 %v458_v5, %v458_v5 }
 0x1f1   :  { %1721 = vmatpush3.bf16.xpose.msra.mxu1 %v674_v53  ;;  %1722 = vmatprep.mubr.msk.bf16.mxu1 %vm2141_vm0, %v2140_v0  ;;  %v490_v7 = vpop.permute.xlu0 %489 }
 0x1f2   :  { %1726 = vmatprep.subr.bf16.mxu1 %v2140_v0  ;;  %v766_v6 = vsel %vm531_vm1, %v500_v3, 0  ;;  %v501_v8 = vpack.c.bf16 %v490_v7, %v490_v7 }
 0x1f3   :  { %v1846_v9 = vpop.permute.xlu1 %1845 }
 0x1f4   :  { %v812_v11 = vsel %vm531_vm1, %v501_v8, 0  ;;  %v1848_v12 = vunpack.i.h.bf16 %v1846_v9  ;;  %v1847_v13 = vunpack.i.l.bf16 %v1846_v9 }
 0x1f5   :  { %v464_v17 = vpop.permute.xlu0 %463 }
 0x1f6   :  { %v502_v14 = vpack.c.bf16 %v1848_v12, %v1848_v12  ;;  %v473_v15 = vpack.c.bf16 %v1847_v13, %v1847_v13  ;;  %v474_v18 = vpack.c.bf16 %v464_v17, %v464_v17 }
 0x1f8   :  { %1723 = vmatmul.mubr.msk.bf16.vlgmr.msra.gmra.mrb[16].mxu1 %vm531_vm1, %v470_v58  ;;  %v858_v16 = vsel %vm531_vm1, %v502_v14, 0 }
 0x1f9   :  { %1727 = vmatpush3.bf16.xpose.msra.mxu1 %v720_v62  ;;  %1728 = vmatprep.mubr.msk.bf16.mxu1 %vm2141_vm0, %v2140_v0 }
 0x1fa   :  { %1732 = vmatprep.subr.bf16.mxu1 %v2140_v0 }
 0x200   :  { %1729 = vmatmul.mubr.msk.bf16.vlgmr.msra.gmra.mrb[20].mxu1 %vm531_vm1, %v471_v4 }
 0x201   :  { %1733 = vmatpush3.bf16.xpose.msra.mxu1 %v766_v6  ;;  %1734 = vmatprep.mubr.msk.bf16.mxu1 %vm2141_vm0, %v2140_v0  ;;  %v440_v6 = vpop.f32.mrb[4].mxu0 }
 0x202   :  { %1738 = vmatprep.subr.bf16.mxu1 %v2140_v0  ;;  %v1700_v7 = vpop.f32.mrb[5].mxu0 }
 0x203   :  { %v443_v8 = vpop.f32.mrb[6].mxu0 }
 0x204   :  { %v1701_v9 = vpop.f32.mrb[7].mxu0  ;;  %v2427_v12 = vpack.i.bf16 %v443_v8, %v440_v6 }
 0x208   :  { %1735 = vmatmul.mubr.msk.bf16.vlgmr.msra.gmra.mrb[24].mxu1 %vm531_vm1, %v472_v10  ;;  %v523_v10 = vpack.c.bf16 %v440_v6, %v440_v6 }
 0x209   :  { %1739 = vmatpush3.bf16.xpose.msra.mxu1 %v812_v11  ;;  %1740 = vmatprep.mubr.msk.bf16.mxu1 %vm2141_vm0, %v2140_v0  ;;  %v524_v11 = vpack.c.bf16 %v443_v8, %v443_v8 }
 0x20a   :  { %1744 = vmatprep.subr.bf16.mxu1 %v2140_v0  ;;  %v1002_v13 = vsel %vm1000_vm3, %v523_v10, 0 }
 0x20b   :  { %1751 = vmatpush3.bf16.msra.mxu0 %v1002_v13  ;;  %v1048_v14 = vsel %vm1000_vm3, %v524_v11, 0 }
 0x20c   :  { %1762 = vmatprep.subr.bf16.mxu0 %v2140_v0 }
 0x210   :  { %1741 = vmatmul.mubr.msk.bf16.vlgmr.msra.gmra.mrb[28].mxu1 %vm531_vm1, %v473_v15 }
 0x211   :  { %1745 = vmatpush3.bf16.xpose.msra.mxu1 %v858_v16  ;;  %1746 = vmatprep.mubr.msk.bf16.mxu1 %vm2141_vm0, %v2140_v0 }
 0x212   :  { %1756 = vmatprep.subr.bf16.mxu1 %v2140_v0 }
 0x218   :  { %1747 = vmatmul.mubr.msk.bf16.vlgmr.msra.gmra.mrb[32].mxu1 %vm531_vm1, %v474_v18 }
 0x219   :  { %1758 = vmatprep.mubr.msk.bf16.mxu1 %vm2141_vm0, %v2140_v0  ;;  %1757 = vmatpush3.bf16.msra.mxu1 %v1048_v14 }
 0x21a   :  { %1768 = vmatprep.subr.bf16.mxu1 %v2140_v0 }
 0x250   :  { %v572_v19 = vpop.f32.mrb[4].mxu1 }
 0x251   :  { %v1706_v20 = vpop.f32.mrb[5].mxu1  ;;  %v901_v21 = vsel %vm900_vm2, %v572_v19, -inf }
 0x252   :  { %v575_v22 = vpop.f32.mrb[6].mxu1  ;;  %902 = vmax.xlane.f32.xlu1 %v901_v21 }
 0x253   :  { %v1707_v23 = vpop.f32.mrb[7].mxu1 }
 0x258   :  { %v618_v24 = vpop.f32.mrb[8].mxu1 }
 0x259   :  { %v1712_v25 = vpop.f32.mrb[9].mxu1  ;;  %v904_v26 = vsel %vm900_vm2, %v618_v24, -inf }
 0x25a   :  { %905 = vmax.xlane.f32.xlu0 %v904_v26  ;;  %v621_v27 = vpop.f32.mrb[10].mxu1 }
 0x25b   :  { %v1713_v28 = vpop.f32.mrb[11].mxu1 }
 0x2c3   :  { %v2398_v29 = vpop.f32.mrb[12].mxu1 }
 0x2c4   :  { %v1718_v30 = vpop.f32.mrb[13].mxu1  ;;  %v907_v31 = vsel %vm900_vm2, %v2398_v29, -inf }
 0x2c5   :  { %908 = vmax.xlane.f32.xlu0 %v907_v31  ;;  %v667_v32 = vpop.f32.mrb[14].mxu1 }
 0x2c6   :  { %v1719_v33 = vpop.f32.mrb[15].mxu1 }
 0x2cb   :  { %v2402_v34 = vpop.f32.mrb[16].mxu1 }
 0x2cc   :  { %v1724_v35 = vpop.f32.mrb[17].mxu1  ;;  %v910_v36 = vsel %vm900_vm2, %v2402_v34, -inf }
 0x2cd   :  { %911 = vmax.xlane.f32.xlu1 %v910_v36  ;;  %v713_v37 = vpop.f32.mrb[18].mxu1 }
 0x2ce   :  { %v1725_v38 = vpop.f32.mrb[19].mxu1 }
 0x2d3   :  { %v2406_v39 = vpop.f32.mrb[20].mxu1 }
 0x2d4   :  { %v1730_v40 = vpop.f32.mrb[21].mxu1  ;;  %v913_v41 = vsel %vm900_vm2, %v2406_v39, -inf }
 0x2d5   :  { %914 = vmax.xlane.f32.xlu0 %v913_v41  ;;  %v759_v42 = vpop.f32.mrb[22].mxu1 }
 0x2d6   :  { %v1731_v43 = vpop.f32.mrb[23].mxu1 }
 0x2db   :  { %v2410_v44 = vpop.f32.mrb[24].mxu1 }
 0x2dc   :  { %v1736_v45 = vpop.f32.mrb[25].mxu1  ;;  %v916_v46 = vsel %vm900_vm2, %v2410_v44, -inf }
 0x2dd   :  { %917 = vmax.xlane.f32.xlu1 %v916_v46  ;;  %v805_v47 = vpop.f32.mrb[26].mxu1 }
 0x2de   :  { %v1737_v48 = vpop.f32.mrb[27].mxu1 }
 0x2df   :  { %v903_v49 = vpop.xlane.xlu1 %902 }
 0x2e0   :  { %v925_v50 = vsub.f32 %v572_v19, %v903_v49 }
 0x2e2   :  { %v933_v51 = vmul.f32 1.442695, %v925_v50 }
 0x2e3   :  { %v2414_v52 = vpop.f32.mrb[28].mxu1 }
 0x2e4   :  { %1911 = vpow2.f32 %v933_v51  ;;  %v1742_v53 = vpop.f32.mrb[29].mxu1  ;;  %v919_v54 = vsel %vm900_vm2, %v2414_v52, -inf }
 0x2e5   :  { %920 = vmax.xlane.f32.xlu0 %v919_v54  ;;  %v851_v55 = vpop.f32.mrb[30].mxu1 }
 0x2e6   :  { %v1743_v56 = vpop.f32.mrb[31].mxu1 }
 0x2e7   :  { %v906_v57 = vpop.xlane.xlu0 %905 }
 0x2e8   :  { %v926_v58 = vsub.f32 %v618_v24, %v906_v57 }
 0x2ea   :  { %v935_v59 = vmul.f32 1.442695, %v926_v58 }
 0x2eb   :  { %v2418_v60 = vpop.f32.mrb[32].mxu1 }
 0x2ec   :  { %1913 = vpow2.f32 %v935_v59  ;;  %v1748_v61 = vpop.f32.mrb[33].mxu1  ;;  %v922_v62 = vsel %vm900_vm2, %v2418_v60, -inf }
 0x2ed   :  { %923 = vmax.xlane.f32.xlu1 %v922_v62  ;;  %v897_v63 = vpop.f32.mrb[34].mxu1 }
 0x2ee   :  { %v1912_v1 = vpop.eup %1911  ;;  %v1749_v2 = vpop.f32.mrb[35].mxu1 }
 0x2ef   :  { %v949_v3 = vsel %vm900_vm2, %v1912_v1, 0.0 }
 0x2f0   :  { %950 = vadd.xlane.f32.xlu0 %v949_v3 }
 0x2f6   :  { %v2423_v4 = vpop.eup %1913 }
 0x2f7   :  { %v952_v5 = vsel %vm900_vm2, %v2423_v4, 0.0 }
 0x2f8   :  { %953 = vadd.xlane.f32.xlu1 %v952_v5 }
 0x352   :  { %v909_v15 = vpop.xlane.xlu0 %908 }
 0x353   :  { %v927_v16 = vsub.f32 %v2398_v29, %v909_v15 }
 0x355   :  { %v937_v17 = vmul.f32 1.442695, %v927_v16 }
 0x357   :  { %1915 = vpow2.f32 %v937_v17 }
 0x35a   :  { %v912_v18 = vpop.xlane.xlu1 %911 }
 0x35b   :  { %v928_v19 = vsub.f32 %v2402_v34, %v912_v18 }
 0x35d   :  { %v939_v20 = vmul.f32 1.442695, %v928_v19 }
 0x35f   :  { %1917 = vpow2.f32 %v939_v20 }
 0x361   :  { %v2435_v21 = vpop.eup %1915 }
 0x362   :  { %v915_v22 = vpop.xlane.xlu0 %914  ;;  %v955_v23 = vsel %vm900_vm2, %v2435_v21, 0.0 }
 0x363   :  { %v929_v24 = vsub.f32 %v2406_v39, %v915_v22  ;;  %956 = vadd.xlane.f32.xlu0 %v955_v23 }
 0x365   :  { %v941_v25 = vmul.f32 1.442695, %v929_v24 }
 0x367   :  { %1919 = vpow2.f32 %v941_v25 }
 0x369   :  { %v1918_v26 = vpop.eup %1917 }
 0x36a   :  { %v918_v27 = vpop.xlane.xlu1 %917  ;;  %v958_v28 = vsel %vm900_vm2, %v1918_v26, 0.0 }
 0x36b   :  { %v930_v29 = vsub.f32 %v2410_v44, %v918_v27  ;;  %959 = vadd.xlane.f32.xlu1 %v958_v28 }
 0x36d   :  { %v943_v30 = vmul.f32 1.442695, %v930_v29 }
 0x36f   :  { %1921 = vpow2.f32 %v943_v30 }
 0x371   :  { %v2442_v31 = vpop.eup %1919 }
 0x372   :  { %v921_v32 = vpop.xlane.xlu0 %920  ;;  %v961_v33 = vsel %vm900_vm2, %v2442_v31, 0.0 }
 0x373   :  { %v931_v34 = vsub.f32 %v2414_v52, %v921_v32  ;;  %962 = vadd.xlane.f32.xlu0 %v961_v33 }
 0x375   :  { %v945_v35 = vmul.f32 1.442695, %v931_v34 }
 0x377   :  { %1923 = vpow2.f32 %v945_v35 }
 0x379   :  { %v2447_v36 = vpop.eup %1921 }
 0x37a   :  { %v964_v37 = vsel %vm900_vm2, %v2447_v36, 0.0  ;;  %v924_v40 = vpop.xlane.xlu1 %923 }
 0x37b   :  { %965 = vadd.xlane.f32.xlu1 %v964_v37  ;;  %v932_v49 = vsub.f32 %v2418_v60, %v924_v40 }
 0x37d   :  { %v951_v38 = vpop.xlane.xlu0 %950  ;;  %v947_v50 = vmul.f32 1.442695, %v932_v49 }
 0x37e   :  { %1925 = vrcp.f32 %v951_v38 }
 0x381   :  { %v2451_v39 = vpop.eup %1923 }
 0x382   :  { %v967_v41 = vsel %vm900_vm2, %v2451_v39, 0.0 }
 0x383   :  { %968 = vadd.xlane.f32.xlu0 %v967_v41 }
 0x385   :  { %v954_v42 = vpop.xlane.xlu1 %953 }
 0x386   :  { %1927 = vrcp.f32 %v954_v42 }
 0x387   :  { %1929 = vpow2.f32 %v947_v50 }
 0x388   :  { %v1926_v43 = vpop.eup %1925 }
 0x389   :  { %v974_v44 = vmul.f32 %v1926_v43, %v1912_v1 }
 0x38b   :  { %v989_v45 = vpack.c.bf16 %v974_v44, %v974_v44 }
 0x38c   :  { %1855 = vrot.lane.b32.xlu1 %v2427_v12, %s2133_s1 }
 0x38d   :  { %1753 = vmatmul.mubr.msk.bf16.vlgmr.msra.gmra.mrb[8].mxu0 %vm900_vm2, %v989_v45  ;;  %v1903_v45 = vld [vmem:[#allocation13] sm:$0xff]  }
 0x38e   :  { %1764 = vmatprep.mubr.msk.bf16.mxu0 %vm2141_vm0, %v2140_v0 }
 0x390   :  { %v1928_v46 = vpop.eup %1927 }
 0x391   :  { %v976_v47 = vmul.f32 %v1928_v46, %v2423_v4  ;;  %v2467_v51 = vpop.eup %1929 }
 0x392   :  { %v970_v52 = vsel %vm900_vm2, %v2467_v51, 0.0 }
 0x393   :  { %v990_v48 = vpack.c.bf16 %v976_v47, %v976_v47 }
 0x395   :  { %1759 = vmatmul.mubr.msk.bf16.vlgmr.msra.gmra.mrb[36].mxu1 %vm900_vm2, %v990_v48 }
 0x396   :  { %1770 = vmatprep.mubr.msk.bf16.mxu1 %vm2141_vm0, %v2140_v0 }
 0x399   :  { %1850 = vrot.lane.b32.xlu0 %v2427_v12, %s2142_s6 }
 0x3b0   :  { %971 = vadd.xlane.f32.xlu1 %v970_v52 }
 0x3c1   :  { %1860 = vrot.lane.b32.xlu1 %v2427_v12, %s2143_s25 }
 0x3f0   :  { %v957_v53 = vpop.xlane.xlu0 %956 }
 0x3f1   :  { %1931 = vrcp.f32 %v957_v53 }
 0x3f8   :  { %v960_v54 = vpop.xlane.xlu1 %959 }
 0x3f9   :  { %1933 = vrcp.f32 %v960_v54  ;;  %v1905_v54 = vld [vmem:[#allocation13 + $0x10] sm:$0xff]  }
 0x3fb   :  { %v1932_v59 = vpop.eup %1931 }
 0x3fc   :  { %v978_v3 = vmul.f32 %v1932_v59, %v2435_v21 }
 0x3fe   :  { %v991_v12 = vpack.c.bf16 %v978_v3, %v978_v3  ;;  %v1908_v3 = vld [vmem:[#allocation13 + $0x28] sm:$0xff]  }
 0x400   :  { %v963_v55 = vpop.xlane.xlu0 %962 }
 0x401   :  { %1935 = vrcp.f32 %v963_v55 }
 0x403   :  { %v1934_v60 = vpop.eup %1933 }
 0x404   :  { %v980_v4 = vmul.f32 %v1934_v60, %v1918_v26 }
 0x406   :  { %v992_v13 = vpack.c.bf16 %v980_v4, %v980_v4  ;;  %v1909_v4 = vld [vmem:[#allocation13 + $0x30] sm:$0xff]  }
 0x408   :  { %v966_v56 = vpop.xlane.xlu1 %965 }
 0x409   :  { %1937 = vrcp.f32 %v966_v56 }
 0x40b   :  { %v1936_v11 = vpop.eup %1935 }
 0x40c   :  { %v1856_v58 = vpop.permute.xlu1 %1855  ;;  %v982_v17 = vmul.f32 %v1936_v11, %v2442_v31 }
 0x40d   :  { %v1858_v62 = vunpack.i.h.bf16 %v1856_v58  ;;  %v1857_v63 = vunpack.i.l.bf16 %v1856_v58 }
 0x40e   :  { %v993_v19 = vpack.c.bf16 %v982_v17, %v982_v17 }
 0x40f   :  { %v528_v7 = vpack.c.bf16 %v1858_v62, %v1858_v62  ;;  %v527_v8 = vpack.c.bf16 %v1857_v63, %v1857_v63  ;;  %v1906_v62 = vld [vmem:[#allocation13 + $0x18] sm:$0xff]  }
 0x410   :  { %v969_v57 = vpop.xlane.xlu0 %968 }
 0x411   :  { %v1186_v15 = vsel %vm1000_vm3, %v527_v8, 0  ;;  %v1232_v16 = vsel %vm1000_vm3, %v528_v7, 0  ;;  %1939 = vrcp.f32 %v969_v57 }
 0x413   :  { %v1938_v14 = vpop.eup %1937 }
 0x414   :  { %v1851_v61 = vpop.permute.xlu0 %1850  ;;  %v984_v18 = vmul.f32 %v1938_v14, %v2447_v36 }
 0x415   :  { %v1853_v1 = vunpack.i.h.bf16 %v1851_v61  ;;  %v1852_v2 = vunpack.i.l.bf16 %v1851_v61 }
 0x416   :  { %v994_v20 = vpack.c.bf16 %v984_v18, %v984_v18 }
 0x417   :  { %v526_v5 = vpack.c.bf16 %v1853_v1, %v1853_v1  ;;  %v525_v6 = vpack.c.bf16 %v1852_v2, %v1852_v2  ;;  %v1907_v2 = vld [vmem:[#allocation13 + $0x20] sm:$0xff]  }
 0x419   :  { %v1094_v9 = vsel %vm1000_vm3, %v525_v6, 0  ;;  %v1140_v10 = vsel %vm1000_vm3, %v526_v5, 0  ;;  %v1910_v5 = vld [vmem:[#allocation13 + $0x38] sm:$0xff]  }
 0x41a   :  { %1763 = vmatpush3.bf16.msra.mxu0 %v1094_v9  ;;  %1769 = vmatpush3.bf16.msra.mxu1 %v1140_v10 }
 0x41b   :  { %1774 = vmatprep.subr.bf16.mxu0 %v2140_v0  ;;  %1780 = vmatprep.subr.bf16.mxu1 %v2140_v0  ;;  %v1940_v22 = vpop.eup %1939 }
 0x41c   :  { %v986_v26 = vmul.f32 %v1940_v22, %v2451_v39 }
 0x41d   :  { %1765 = vmatmul.mubr.msk.bf16.vlgmr.msra.gmra.mrb[12].mxu0 %vm900_vm2, %v991_v12  ;;  %1771 = vmatmul.mubr.msk.bf16.vlgmr.msra.gmra.mrb[40].mxu1 %vm900_vm2, %v992_v13 }
 0x41e   :  { %1775 = vmatpush3.bf16.msra.mxu0 %v1186_v15  ;;  %1781 = vmatpush3.bf16.msra.mxu1 %v1232_v16  ;;  %v995_v32 = vpack.c.bf16 %v986_v26, %v986_v26 }
 0x41f   :  { %1776 = vmatprep.mubr.msk.bf16.mxu0 %vm2141_vm0, %v2140_v0  ;;  %1782 = vmatprep.mubr.msk.bf16.mxu1 %vm2141_vm0, %v2140_v0 }
 0x420   :  { %1786 = vmatprep.subr.bf16.mxu0 %v2140_v0  ;;  %1792 = vmatprep.subr.bf16.mxu1 %v2140_v0 }
 0x425   :  { %1777 = vmatmul.mubr.msk.bf16.vlgmr.msra.gmra.mrb[16].mxu0 %vm900_vm2, %v993_v19  ;;  %1783 = vmatmul.mubr.msk.bf16.vlgmr.msra.gmra.mrb[44].mxu1 %vm900_vm2, %v994_v20 }
 0x426   :  { %1788 = vmatprep.mubr.msk.bf16.mxu0 %vm2141_vm0, %v2140_v0  ;;  %1794 = vmatprep.mubr.msk.bf16.mxu1 %vm2141_vm0, %v2140_v0 }
 0x43d   :  { %v972_v21 = vpop.xlane.xlu1 %971 }
 0x43e   :  { %1941 = vrcp.f32 %v972_v21 }
 0x441   :  { %v1861_v23 = vpop.permute.xlu1 %1860 }
 0x442   :  { %v1863_v24 = vunpack.i.h.bf16 %v1861_v23  ;;  %v1862_v25 = vunpack.i.l.bf16 %v1861_v23 }
 0x444   :  { %v530_v27 = vpack.c.bf16 %v1863_v24, %v1863_v24  ;;  %v529_v28 = vpack.c.bf16 %v1862_v25, %v1862_v25 }
 0x446   :  { %v1278_v29 = vsel %vm1000_vm3, %v529_v28, 0  ;;  %v1324_v30 = vsel %vm1000_vm3, %v530_v27, 0 }
 0x447   :  { %1787 = vmatpush3.bf16.msra.mxu0 %v1278_v29  ;;  %1793 = vmatpush3.bf16.msra.mxu1 %v1324_v30 }
 0x448   :  { %v1942_v31 = vpop.eup %1941  ;;  %1798 = vmatprep.subr.bf16.mxu0 %v2140_v0 }
 0x449   :  { %v988_v33 = vmul.f32 %v1942_v31, %v2467_v51  ;;  %v1904_v51 = vld [vmem:[#allocation13 + $0x8] sm:$0xff]  }
 0x44a   :  { %1789 = vmatmul.mubr.msk.bf16.vlgmr.msra.gmra.mrb[20].mxu0 %vm900_vm2, %v995_v32 }
 0x44b   :  { %v996_v34 = vpack.c.bf16 %v988_v33, %v988_v33  ;;  %1814 = vmatprep.mubr.msk.bf16.mxu0 %vm2141_vm0, %v2140_v0  ;;  %1799 = vmatpush3.bf16.msra.mxu0 %v1903_v45 }
 0x44c   :  { %1800 = vmatprep.subr.bf16.mxu0 %v2140_v0 }
 0x44d   :  { %1795 = vmatmul.mubr.msk.bf16.vlgmr.msra.gmra.mrb[48].mxu1 %vm900_vm2, %v996_v34 }
 0x44f   :  { %1801 = vmatpush3.bf16.msra.mxu0 %v1904_v51 }
 0x450   :  { %1802 = vmatprep.subr.bf16.mxu0 %v2140_v0 }
 0x453   :  { %1803 = vmatpush3.bf16.msra.mxu0 %v1905_v54 }
 0x454   :  { %1804 = vmatprep.subr.bf16.mxu0 %v2140_v0 }
 0x457   :  { %1805 = vmatpush3.bf16.msra.mxu0 %v1906_v62 }
 0x458   :  { %1806 = vmatprep.subr.bf16.mxu0 %v2140_v0 }
 0x45b   :  { %1807 = vmatpush3.bf16.msra.mxu0 %v1907_v2 }
 0x45c   :  { %1808 = vmatprep.subr.bf16.mxu0 %v2140_v0 }
 0x45f   :  { %1809 = vmatpush3.bf16.msra.mxu0 %v1908_v3 }
 0x460   :  { %v2505_v35 = vpop.f32.mrb[8].mxu0  ;;  %1810 = vmatprep.subr.bf16.mxu0 %v2140_v0 }
 0x461   :  { %v1754_v36 = vpop.f32.mrb[9].mxu0 }
 0x462   :  { %v1041_v37 = vpop.f32.mrb[10].mxu0 }
 0x463   :  { %v1755_v38 = vpop.f32.mrb[11].mxu0  ;;  %1811 = vmatpush3.bf16.msra.mxu0 %v1909_v4 }
 0x464   :  { %1812 = vmatprep.subr.bf16.mxu0 %v2140_v0 }
 0x467   :  { %1813 = vmatpush3.bf16.msra.mxu0 %v1910_v5 }
 0x468   :  { %v2507_v39 = vpop.f32.mrb[36].mxu1 }
 0x469   :  { %v1760_v40 = vpop.f32.mrb[37].mxu1 }
 0x46a   :  { %v1087_v41 = vpop.f32.mrb[38].mxu1 }
 0x46b   :  { %v1761_v42 = vpop.f32.mrb[39].mxu1 }
 0x4f0   :  { %v1130_v43 = vpop.f32.mrb[12].mxu0  ;;  %v1176_v44 = vpop.f32.mrb[40].mxu1 }
 0x4f1   :  { %v1864_v46 = vpack.i.bf16 %v1176_v44, %v1130_v43  ;;  %v1766_v47 = vpop.f32.mrb[13].mxu0  ;;  %v1772_v48 = vpop.f32.mrb[41].mxu1 }
 0x4f2   :  { %v1133_v49 = vpop.f32.mrb[14].mxu0  ;;  %v1179_v50 = vpop.f32.mrb[42].mxu1 }
 0x4f3   :  { %v1773_v52 = vpop.f32.mrb[43].mxu1  ;;  %1865 = vrot.lane.b32.xlu0 %v1864_v46, %s2143_s25  ;;  %v1767_v53 = vpop.f32.mrb[15].mxu0 }
 0x4f8   :  { %v1222_v55 = vpop.f32.mrb[16].mxu0  ;;  %v1268_v56 = vpop.f32.mrb[44].mxu1 }
 0x4f9   :  { %v1869_v57 = vpack.i.bf16 %v1268_v56, %v1222_v55  ;;  %v1778_v58 = vpop.f32.mrb[17].mxu0  ;;  %v1784_v59 = vpop.f32.mrb[45].mxu1 }
 0x4fa   :  { %v1225_v60 = vpop.f32.mrb[18].mxu0  ;;  %v1271_v61 = vpop.f32.mrb[46].mxu1 }
 0x4fb   :  { %v1785_v63 = vpop.f32.mrb[47].mxu1  ;;  %1870 = vrot.lane.b32.xlu1 %v1869_v57, %s2133_s1  ;;  %v1779_v1 = vpop.f32.mrb[19].mxu0  ;;  %s2144_s1 = smov [#allocation14]  }
 0x4fc   :  { %s1511_s0 = sshll.u32 %s2144_s1, 4  ;;  %s1512_s0 = int_to_ptr.vmem [resolvable:$true] %s1511_s0 }
 0x4fd   :  { %s2097_s9 = scalar_lea.vmem %s1512_s0, 256  ;;  %p2102_p1 = scmp.lt.s32.totalorder %s1512_s0, %s1512_s0 }
 0x4fe   :  { %p2098_p0 = scmp.ne.s32.totalorder %s1512_s0, %s2097_s9  ;;  %p2103_p2 = scmp.lt.s32.totalorder %s2097_s9, %s2097_s9 }
 0x500   :  { %p2104_p3 = por %p2103_p2, %p2102_p1 }
 0x502   :  { %p2105_p4 = pnand %p2104_p3, %p2098_p0 }
 0x51d   :  { %v1314_v6 = vpop.f32.mrb[20].mxu0 }
 0x51e   :  { %v1790_v7 = vpop.f32.mrb[21].mxu0 }
 0x51f   :  { %v1317_v8 = vpop.f32.mrb[22].mxu0 }
 0x520   :  { %v1791_v9 = vpop.f32.mrb[23].mxu0  ;;  %v1360_v10 = vpop.f32.mrb[48].mxu1 }
 0x521   :  { %v1874_v11 = vpack.i.bf16 %v1360_v10, %v1314_v6  ;;  %v1796_v12 = vpop.f32.mrb[49].mxu1 }
 0x522   :  { %v1363_v13 = vpop.f32.mrb[50].mxu1 }
 0x523   :  { %v1797_v14 = vpop.f32.mrb[51].mxu1  ;;  %1875 = vrot.lane.b32.xlu0 %v1874_v11, %s2142_s6 }
 0x565   :  { %v1866_v15 = vpop.permute.xlu0 %1865 }
 0x566   :  { %v1868_v17 = vunpack.i.h.bf16 %v1866_v15  ;;  %v1867_v18 = vunpack.i.l.bf16 %v1866_v15 }
 0x568   :  { %v1391_v21 = vsel %vm531_vm1, %v2507_v39, %v1868_v17  ;;  %v1390_v22 = vsel %vm531_vm1, %v2505_v35, %v1867_v18 }
 0x56d   :  { %v1871_v16 = vpop.permute.xlu1 %1870 }
 0x56e   :  { %v1873_v19 = vunpack.i.h.bf16 %v1871_v16  ;;  %v1872_v20 = vunpack.i.l.bf16 %v1871_v16 }
 0x570   :  { %v1394_v25 = vsel %vm1392_vm4, %v1391_v21, %v1873_v19  ;;  %v1393_v26 = vsel %vm1392_vm4, %v1390_v22, %v1872_v20 }
 0x595   :  { %v1876_v0 = vpop.permute.xlu0 %1875 }
 0x596   :  { %v1878_v23 = vunpack.i.h.bf16 %v1876_v0  ;;  %v1877_v24 = vunpack.i.l.bf16 %v1876_v0 }
 0x598   :  { %v1397_v27 = vsel %vm1395_vm5, %v1394_v25, %v1878_v23  ;;  %v1396_v28 = vsel %vm1395_vm5, %v1393_v26, %v1877_v24 }
 0x599   :  { %v1398_v29 = vpack.c.bf16 %v1397_v27, %v1396_v28 }
 0x59b   :  { %1815 = vmatmul.mubr.bf16.vlgmr.msra.gmra.mrb[24].mxu0 %v1398_v29 }
 0x66e   :  { %v1497_v30 = vpop.f32.mrb[24].mxu0 }
 0x66f   :  { %1504 = vst [vmem:[#allocation14] sm:$0xff] %v1497_v30  ;;  %v1816_v31 = vpop.f32.mrb[25].mxu0 }
 0x670   :  { %v1500_v32 = vpop.f32.mrb[26].mxu0 }
 0x671   :  { %1505 = vst [vmem:[#allocation14 + $0x8] sm:$0xff] %v1500_v32  ;;  %v1817_v33 = vpop.f32.mrb[27].mxu0 }
 0x672   :  { %2108 = shalt.err (!%p2105_p4)
}
 0x673   :  { %s2109_s22 = scalar_lea.hbm %s2545_s7, 256 }
 0x674   :  { %p2110_p5 = scmp.ne.s32.totalorder %s2545_s7, %s2109_s22  ;;  %p2113_p6 = scmp.lt.u32.totalorder %s2109_s22, %s2545_s7 }
 0x676   :  { %p2115_p7 = pnand %p2113_p6, %p2110_p5 }
 0x678   :  { %2118 = shalt.err (!%p2115_p7)
}
 0x679   :  { %1517 = dma.vmem_to_hbm [thread:$0]  %s1512_s0, 256, %s2545_s7, [#allocation4], %s2131_s13, %s2131_s13, %s2132_s14  }
 0x67a   :  { %2127 = dma.done.wait [#allocation4], 256  }
 0x67b   :  { %2128 = vsyncadd [#allocation4], 4294967040 }
 0x67c   :  { %1521 = vsyncpa [#allocation3], 1 }
 0x67d   :  { %1522 = vsyncpa [#allocation6], 1 }
 0x67e   :  { %1523 = vsyncpa [#allocation9], 1 }
 0x67f   :  { %1524 = vsyncpa [#allocation12], 1 }
 0x680   :  { %1525 = vsyncpa [#allocation4], 1 }

</bundles_post_ra>
